<compile_context>
chip_gen: v6e
topology: v6e:2x2x1
jax: 0.10.0
libtpu: 0.0.40
codegen_flags: <defaults>
</compile_context>

<pallas_src>
import functools

import jax
import jax.numpy as jnp
from jax.experimental import pallas as pl
from jax.experimental.pallas import tpu as pltpu

BN_EPS = 1e-5


def _round_up(n: int, m: int) -> int:
    return ((n + m - 1) // m) * m


def har_mlp_kernel(x_ref, w1_ref, b1_ref, w2_ref, b2_ref, w3_ref, b3_ref, ot_ref):
    """One batch tile: x (tb, F) -> logits stored batch-major as (o_rows, tb).

    fc1/fc2 have eval-mode BatchNorm pre-folded; dropout1/dropout2 are identity
    in eval mode.  All matmuls run bf16 x bf16 with f32 MXU accumulation.
    """
    # fc1 (+ folded BN1) -> ReLU
    h = jnp.dot(x_ref[...], w1_ref[...], preferred_element_type=jnp.float32)
    h = jnp.maximum(h + b1_ref[...], 0.0).astype(w2_ref.dtype)
    # fc2 (+ folded BN2) -> ReLU
    h = jnp.dot(h, w2_ref[...], preferred_element_type=jnp.float32)
    h = jnp.maximum(h + b2_ref[...], 0.0).astype(w3_ref.dtype)
    # fc3: (tb, 128) f32 (output columns zero-padded to a lane-dense 128), then
    # transpose to batch-major on the XLU (idle here) and store only the first
    # o_rows sublanes -> ~16x less output HBM writeback than a (tb, 128) store.
    o = jnp.dot(h, w3_ref[...], preferred_element_type=jnp.float32) + b3_ref[...]
    ot = jnp.transpose(o)                                       # (128, tb)
    ot_ref[...] = ot[: ot_ref.shape[0], :].astype(ot_ref.dtype)
    # TODO(synk): training-mode dropout omitted (module run in eval mode); it
    # would need pltpu.prng_seed / prng_random_bits masking.


def prepare_params(p, *, compute_dtype=jnp.bfloat16, o_cols=128):
    """Host-side precompute.  Call ONCE at model load (not per forward):
      * fold eval-mode BatchNorm1d into fc1/fc2:  W' = W*s, b' = (b-m)*s + beta,
        s = gamma * rsqrt(var + eps)
      * cast weights to bf16 (MXU-native; halves HBM/VMEM), biases stay f32
      * zero-pad fc3 to a lane-dense 128 output columns
    Returns (folded_param_tuple, out_size)."""
    def fold(w, b, g, be, m, v):
        s = g * jax.lax.rsqrt(v + BN_EPS)            # (1, H)
        return w * s, (b - m) * s + be               # (in, H), (1, H)

    w1, b1 = fold(p["w1"], p["b1"], p["g1"], p["be1"], p["m1"], p["v1"])
    w2, b2 = fold(p["w2"], p["b2"], p["g2"], p["be2"], p["m2"], p["v2"])
    w3, b3 = p["w3"], p["b3"]
    out_size = w3.shape[1]
    o_pad = max(o_cols, _round_up(out_size, o_cols))
    w3p = jnp.zeros((w3.shape[0], o_pad), jnp.float32).at[:, :out_size].set(w3)
    b3p = jnp.zeros((1, o_pad), jnp.float32).at[:, :out_size].set(b3)
    folded = (
        w1.astype(compute_dtype), b1.astype(jnp.float32),
        w2.astype(compute_dtype), b2.astype(jnp.float32),
        w3p.astype(compute_dtype), b3p.astype(jnp.float32),
    )
    return folded, out_size


@functools.partial(jax.jit, static_argnames=("out_size", "block_b", "out_dtype"))
def har_mlp_forward(x, folded, *, out_size, block_b=2048, out_dtype=jnp.bfloat16):
    """x: (B, F).  Returns (B, out_size) logits (dtype out_dtype)."""
    w1, b1, w2, b2, w3, b3 = folded
    B, F = x.shape
    assert block_b % 128 == 0, "block_b must be a multiple of 128"

    x = x.astype(w1.dtype)        # no-op if the caller already supplies bf16

    # Batch tile: keep it a multiple of 128 so the in-kernel (tb,128)->(128,tb)
    # transpose and the batch-major output store stay fully tile-aligned.
    # Ragged B is handled by Pallas' masked boundary blocks (no jnp.pad pass).
    tb = block_b if B >= block_b else _round_up(B, 128)
    grid_b = pl.cdiv(B, tb)
    o_rows = max(8, _round_up(out_size, 8))

    resident = lambda a: pl.BlockSpec(a.shape, lambda i: (0, 0))  # VMEM-resident weights

    out_t = pl.pallas_call(
        har_mlp_kernel,
        out_shape=jax.ShapeDtypeStruct((o_rows, B), out_dtype),   # batch-major, lane-dense
        grid=(grid_b,),
        in_specs=[
            pl.BlockSpec((tb, F), lambda i: (i, 0)),              # x: streamed per tile
            resident(w1), resident(b1),
            resident(w2), resident(b2),
            resident(w3), resident(b3),
        ],
        out_specs=pl.BlockSpec((o_rows, tb), lambda i: (0, i)),
        compiler_params=pltpu.CompilerParams(
            # Single batch axis, embarrassingly parallel.  On v7x, consider
            # pltpu.CORE_PARALLEL here (and block_b up to 8192 with
            # vmem_limit_bytes raised) to guarantee a 2-TensorCore split.
            dimension_semantics=(pltpu.PARALLEL,)),
    )(x, w1, b1, w2, b2, w3, b3)

    # Tiny epilogue: (o_rows, B) -> (B, out_size).  Touches only ~6*B elements.
    return out_t[:out_size, :].T


def init_params(key, input_size, hidden_size, output_size):
    """Parameters mirroring HAR_MLP_v2.init_weights() (xavier_uniform weights,
    zero biases) plus non-trivial BatchNorm affine/running stats so the BN
    folding path is actually exercised.  Weights stored transposed as [in, out]."""
    def xavier_uniform(k, fan_in, fan_out):
        limit = jnp.sqrt(6.0 / (fan_in + fan_out))
        return jax.random.uniform(k, (fan_in, fan_out), jnp.float32,
                                  minval=-limit, maxval=limit)

    ks = jax.random.split(key, 11)
    H, O = hidden_size, output_size
    u = lambda k, n, lo, hi: jax.random.uniform(k, (1, n), jnp.float32,
                                                minval=lo, maxval=hi)
    return {
        "w1": xavier_uniform(ks[0], input_size, H), "b1": jnp.zeros((1, H), jnp.float32),
        "g1": u(ks[1], H, 0.5, 1.5), "be1": u(ks[2], H, -0.5, 0.5),
        "m1": u(ks[3], H, -0.5, 0.5), "v1": u(ks[4], H, 0.5, 2.0),
        "w2": xavier_uniform(ks[5], H, H), "b2": jnp.zeros((1, H), jnp.float32),
        "g2": u(ks[6], H, 0.5, 1.5), "be2": u(ks[7], H, -0.5, 0.5),
        "m2": u(ks[8], H, -0.5, 0.5), "v2": u(ks[9], H, 0.5, 2.0),
        "w3": xavier_uniform(ks[10], H, O), "b3": jnp.zeros((1, O), jnp.float32),
    }


def reference_forward(x, p):
    """Pure-JAX f32 reference of the original module (eval mode):
    Linear -> BN -> ReLU (x2) -> Linear.  Dropout is identity in eval."""
    def bn_relu(h, g, be, m, v):
        return jnp.maximum((h - m) * jax.lax.rsqrt(v + BN_EPS) * g + be, 0.0)

    h = bn_relu(x @ p["w1"] + p["b1"], p["g1"], p["be1"], p["m1"], p["v1"])
    h = bn_relu(h @ p["w2"] + p["b2"], p["g2"], p["be2"], p["m2"], p["v2"])
    return h @ p["w3"] + p["b3"]


def reference_forward_folded(x_lp, folded, out_size):
    """Pure-JAX reference that mirrors the kernel's exact math (same folded
    bf16 params, f32 accumulation, bf16 intermediate casts)."""
    w1, b1, w2, b2, w3, b3 = folded
    h = jnp.maximum(jnp.dot(x_lp, w1, preferred_element_type=jnp.float32) + b1, 0.0)
    h = h.astype(w2.dtype)
    h = jnp.maximum(jnp.dot(h, w2, preferred_element_type=jnp.float32) + b2, 0.0)
    h = h.astype(w3.dtype)
    o = jnp.dot(h, w3, preferred_element_type=jnp.float32) + b3
    return o[:, :out_size]


if __name__ == "__main__":
    # Small shapes consistent with the HAR MLP (flattened tabular features).
    # hidden_size=128 matches the module default.  block_b=128 (the production
    # default is 2048) gives a 2-step grid with a ragged boundary block
    # (200 = 128 + 72), exercising streamed x tiles, resident weights and the
    # masked batch-major output store.
    batch, input_size, hidden_size, output_size = 200, 64, 128, 6

    key = jax.random.PRNGKey(0)
    kx, kp = jax.random.split(key)
    x = jax.random.normal(kx, (batch, input_size), jnp.float32)
    params = init_params(kp, input_size, hidden_size, output_size)

    # One-time host-side precompute (BN fold + bf16 cast + fc3 padding).
    folded, out_size = prepare_params(params)
    x_bf16 = x.astype(jnp.bfloat16)        # cast once at data prep, not per call

    out = jax.block_until_ready(
        har_mlp_forward(x_bf16, folded, out_size=out_size, block_b=128))
    assert out.shape == (batch, output_size), out.shape
    out_f32 = out.astype(jnp.float32)

    # (1) Tight check against a reference that mirrors the kernel math exactly.
    ref_q = reference_forward_folded(x_bf16, folded, out_size)
    err_q = float(jnp.max(jnp.abs(out_f32 - ref_q)))
    assert err_q < 3e-2, err_q

    # (2) Loose check against the full-precision module semantics (bf16
    #     quantization of x/weights/output accounts for the slack).
    ref_f = reference_forward(x, params)
    err_f = float(jnp.max(jnp.abs(out_f32 - ref_f)))
    assert err_f < 2.5e-1, err_f

    print("KERNEL_OK")
</pallas_src>

<mosaic_0001>
module attributes {stable_mosaic.version = 11 : i64} {
  func.func @har_mlp_kernel(%arg0: i32, %arg1: memref<128x64xbf16, #tpu.memory_space<vmem>>, %arg2: memref<64x128xbf16, #tpu.memory_space<vmem>>, %arg3: memref<1x128xf32, #tpu.memory_space<vmem>>, %arg4: memref<128x128xbf16, #tpu.memory_space<vmem>>, %arg5: memref<1x128xf32, #tpu.memory_space<vmem>>, %arg6: memref<128x128xbf16, #tpu.memory_space<vmem>>, %arg7: memref<1x128xf32, #tpu.memory_space<vmem>>, %arg8: memref<8x128xbf16, #tpu.memory_space<vmem>>) attributes {dimension_semantics = [#tpu.dimension_semantics<parallel>], iteration_bounds = array<i64: 2>, scalar_prefetch = 0 : i64, scratch_operands = 0 : i64, tpu.core_type = #tpu.core_type<tc>, window_params = [{transform_indices = @transform_0, window_bounds = array<i64: 128, 64>}, {pipeline_mode = #tpu.pipeline_mode<synchronous>, transform_indices = @transform_1, window_bounds = array<i64: 64, 128>}, {pipeline_mode = #tpu.pipeline_mode<synchronous>, transform_indices = @transform_2, window_bounds = array<i64: 1, 128>}, {pipeline_mode = #tpu.pipeline_mode<synchronous>, transform_indices = @transform_3, window_bounds = array<i64: 128, 128>}, {pipeline_mode = #tpu.pipeline_mode<synchronous>, transform_indices = @transform_4, window_bounds = array<i64: 1, 128>}, {pipeline_mode = #tpu.pipeline_mode<synchronous>, transform_indices = @transform_5, window_bounds = array<i64: 128, 128>}, {pipeline_mode = #tpu.pipeline_mode<synchronous>, transform_indices = @transform_6, window_bounds = array<i64: 1, 128>}, {transform_indices = @transform_7, window_bounds = array<i64: 8, 128>}]} {
    %c0 = arith.constant 0 : index
    %c0_0 = arith.constant 0 : index
    %0 = vector.load %arg1[%c0, %c0_0] : memref<128x64xbf16, #tpu.memory_space<vmem>>, vector<128x64xbf16>
    %c0_1 = arith.constant 0 : index
    %c0_2 = arith.constant 0 : index
    %1 = vector.load %arg2[%c0_1, %c0_2] : memref<64x128xbf16, #tpu.memory_space<vmem>>, vector<64x128xbf16>
    %cst = arith.constant dense<0.000000e+00> : vector<128x128xf32>
    %2 = tpu.matmul %0, %1, %cst {dimension_numbers = #tpu.dot_dimension_numbers<[1], [0], [0], [1], [0, 0, 1, 1], [], []>} : vector<128x64xbf16>, vector<64x128xbf16>, vector<128x128xf32> -> vector<128x128xf32>
    %c0_3 = arith.constant 0 : index
    %c0_4 = arith.constant 0 : index
    %3 = vector.load %arg3[%c0_3, %c0_4] : memref<1x128xf32, #tpu.memory_space<vmem>>, vector<1x128xf32>
    %4 = vector.broadcast %3 : vector<1x128xf32> to vector<128x128xf32>
    %5 = arith.addf %2, %4 : vector<128x128xf32>
    %cst_5 = arith.constant 0.000000e+00 : f32
    %6 = vector.broadcast %cst_5 : f32 to vector<128x128xf32>
    %7 = arith.maximumf %5, %6 : vector<128x128xf32>
    %8 = arith.truncf %7 : vector<128x128xf32> to vector<128x128xbf16>
    %c0_6 = arith.constant 0 : index
    %c0_7 = arith.constant 0 : index
    %9 = vector.load %arg4[%c0_6, %c0_7] : memref<128x128xbf16, #tpu.memory_space<vmem>>, vector<128x128xbf16>
    %cst_8 = arith.constant dense<0.000000e+00> : vector<128x128xf32>
    %10 = tpu.matmul %8, %9, %cst_8 {dimension_numbers = #tpu.dot_dimension_numbers<[1], [0], [0], [1], [0, 0, 1, 1], [], []>} : vector<128x128xbf16>, vector<128x128xbf16>, vector<128x128xf32> -> vector<128x128xf32>
    %c0_9 = arith.constant 0 : index
    %c0_10 = arith.constant 0 : index
    %11 = vector.load %arg5[%c0_9, %c0_10] : memref<1x128xf32, #tpu.memory_space<vmem>>, vector<1x128xf32>
    %12 = vector.broadcast %11 : vector<1x128xf32> to vector<128x128xf32>
    %13 = arith.addf %10, %12 : vector<128x128xf32>
    %cst_11 = arith.constant 0.000000e+00 : f32
    %14 = vector.broadcast %cst_11 : f32 to vector<128x128xf32>
    %15 = arith.maximumf %13, %14 : vector<128x128xf32>
    %16 = arith.truncf %15 : vector<128x128xf32> to vector<128x128xbf16>
    %c0_12 = arith.constant 0 : index
    %c0_13 = arith.constant 0 : index
    %17 = vector.load %arg6[%c0_12, %c0_13] : memref<128x128xbf16, #tpu.memory_space<vmem>>, vector<128x128xbf16>
    %cst_14 = arith.constant dense<0.000000e+00> : vector<128x128xf32>
    %18 = tpu.matmul %16, %17, %cst_14 {dimension_numbers = #tpu.dot_dimension_numbers<[1], [0], [0], [1], [0, 0, 1, 1], [], []>} : vector<128x128xbf16>, vector<128x128xbf16>, vector<128x128xf32> -> vector<128x128xf32>
    %c0_15 = arith.constant 0 : index
    %c0_16 = arith.constant 0 : index
    %19 = vector.load %arg7[%c0_15, %c0_16] : memref<1x128xf32, #tpu.memory_space<vmem>>, vector<1x128xf32>
    %20 = vector.broadcast %19 : vector<1x128xf32> to vector<128x128xf32>
    %21 = arith.addf %18, %20 : vector<128x128xf32>
    %22 = tpu.transpose %21, [1, 0] : vector<128x128xf32> -> vector<128x128xf32>
    %23 = vector.extract_strided_slice %22 {offsets = [0, 0], sizes = [8, 128], strides = [1, 1]} : vector<128x128xf32> to vector<8x128xf32>
    %24 = arith.truncf %23 : vector<8x128xf32> to vector<8x128xbf16>
    %c0_17 = arith.constant 0 : index
    %c0_18 = arith.constant 0 : index
    %25 = vector.load %arg8[%c0_17, %c0_18] : memref<8x128xbf16, #tpu.memory_space<vmem>>, vector<8x128xbf16>
    tpu.vector_store %arg8[%c0_17, %c0_18], %24 {strides = array<i32>} : memref<8x128xbf16, #tpu.memory_space<vmem>>, vector<8x128xbf16>,
    return
  }
  func.func @transform_0(%arg0: i32) -> (i32, i32) {
    %c0_i32 = arith.constant 0 : i32
    %c0_i32_0 = arith.constant 0 : i32
    return %arg0, %c0_i32 : i32, i32
  }
  func.func @transform_1(%arg0: i32) -> (i32, i32) {
    %c0_i32 = arith.constant 0 : i32
    %c0_i32_0 = arith.constant 0 : i32
    %c0_i32_1 = arith.constant 0 : i32
    return %c0_i32, %c0_i32_0 : i32, i32
  }
  func.func @transform_2(%arg0: i32) -> (i32, i32) {
    %c0_i32 = arith.constant 0 : i32
    %c0_i32_0 = arith.constant 0 : i32
    %c0_i32_1 = arith.constant 0 : i32
    return %c0_i32, %c0_i32_0 : i32, i32
  }
  func.func @transform_3(%arg0: i32) -> (i32, i32) {
    %c0_i32 = arith.constant 0 : i32
    %c0_i32_0 = arith.constant 0 : i32
    %c0_i32_1 = arith.constant 0 : i32
    return %c0_i32, %c0_i32_0 : i32, i32
  }
  func.func @transform_4(%arg0: i32) -> (i32, i32) {
    %c0_i32 = arith.constant 0 : i32
    %c0_i32_0 = arith.constant 0 : i32
    %c0_i32_1 = arith.constant 0 : i32
    return %c0_i32, %c0_i32_0 : i32, i32
  }
  func.func @transform_5(%arg0: i32) -> (i32, i32) {
    %c0_i32 = arith.constant 0 : i32
    %c0_i32_0 = arith.constant 0 : i32
    %c0_i32_1 = arith.constant 0 : i32
    return %c0_i32, %c0_i32_0 : i32, i32
  }
  func.func @transform_6(%arg0: i32) -> (i32, i32) {
    %c0_i32 = arith.constant 0 : i32
    %c0_i32_0 = arith.constant 0 : i32
    %c0_i32_1 = arith.constant 0 : i32
    return %c0_i32, %c0_i32_0 : i32, i32
  }
  func.func @transform_7(%arg0: i32) -> (i32, i32) {
    %c0_i32 = arith.constant 0 : i32
    %c0_i32_0 = arith.constant 0 : i32
    return %c0_i32, %arg0 : i32, i32
  }
}

</mosaic_0001>

<bundles_post_ra>
// kernel: har_mlp_forward.1
= control target key start
LH: loop header
LB: loop body
LE: loop exit
PB: predicated region body
PF: predicated region fallthrough
CT: control target
= control target key end

     0   :  { %s1269_s24 = smov 0   ;;  %s1408_s0 = inlined_call_operand.vmem [shape: bf16[200,64], index: 0, kind: input, shape index: {}]   ;;  %s1409_s1 = inlined_call_operand.vmem [shape: bf16[64,128], index: 1, kind: input, shape index: {}]   ;;  %s1410_s2 = inlined_call_operand.vmem [shape: f32[1,128], index: 2, kind: input, shape index: {}]   ;;  %s1411_s3 = inlined_call_operand.vmem [shape: bf16[128,128], index: 3, kind: input, shape index: {}]   ;;  %s1412_s4 = inlined_call_operand.vmem [shape: f32[1,128], index: 4, kind: input, shape index: {}]   ;;  %s1413_s5 = inlined_call_operand.vmem [shape: bf16[128,128], index: 5, kind: input, shape index: {}]   ;;  %s1414_s6 = inlined_call_operand.vmem [shape: f32[1,128], index: 6, kind: input, shape index: {}]   ;;  %s1415_s7 = inlined_call_operand.vmem [shape: bf16[8,200], index: 7, kind: output, shape index: {}]  }
   0x1 LB: > { %s1275_s25 = sadd.s32 4294967295, %s1227_s24   ;;  %p992_p0 = scmp.ge.s32.totalorder %s1227_s24, 1  ;;  %s1227_s24 = sphi %s1269_s24, %s17_s24  }
   0x2   : > { %p246_p1 = scmp.lt.s32.totalorder %s1227_s24, 3 }
   0x4   : > { %p247_p2 = pnand %p992_p0, %p246_p1 }
   0x5   : > { %s993_s28 = sshll.u32 (!%p247_p2), %s1275_s25, 4  ;;  %p295_p4 = scmp.lt.s32.totalorder (!%p247_p2), %s1275_s25, 1 }
   0x6   : > { %250 = sbr.rel (%p247_p2) target bundleno = 765 (0x2fd), region = 48  ;;  %p286_p3 = scmp.lt.s32.totalorder (!%p247_p2), %s993_s28, 24 }
   0xb   : > { %v1193_v0 = vld [vmem:[%s1409_s1 + $0x18] sm:$0xff]   ;;  %v1194_v1 = vld [vmem:[%s1409_s1 + $0x10] sm:$0xff]   ;;  %v1195_v2 = vld [vmem:[%s1409_s1 + $0x8] sm:$0xff]   ;;  %s1417_s28 = smov (!%p286_p3, %s993_s28), 24  ;;  %vm395_vm0 = vcmask 523264   ;;  %s1419_s25 = smov (!%p295_p4, %s1275_s25), 1 }
   0xc   : > { %1081 = vmatprep.subr.bf16.mxu0 %v1193_v0  ;;  %v1205_v3 = vld [vmem:[%s1411_s3 + $0x38] sm:$0xff]   ;;  %s994_s12 = sshll.u32 %s1417_s28, 2  ;;  %v1206_v4 = vld [vmem:[%s1411_s3 + $0x30] sm:$0xff]   ;;  %v1196_v5 = vld [vmem:[%s1409_s1] sm:$0xff]  }
   0xd   : > { %1082 = vmatpush3.bf16.msra.mxu0 %v1193_v0  ;;  %s1301_s19 = scalar_lea.vmem %s1408_s0, %s994_s12  ;;  %1105 = vmatprep.subr.bf16.mxu1 %v1205_v3  ;;  %v1207_v7 = vld [vmem:[%s1411_s3 + $0x28] sm:$0xff]   ;;  %v1208_v10 = vld [vmem:[%s1411_s3 + $0x20] sm:$0xff]   ;;  %v1209_v11 = vld [vmem:[%s1411_s3 + $0x18] sm:$0xff]   ;;  %s995_s12 = sshll.u32 %s1419_s25, 2 }
   0xe   : > { %1083 = vmatprep.subr.bf16.mxu0 %v1194_v1  ;;  %v1197_v6 = vld [vmem:[%s1301_s19] sm:$0xff]   ;;  %1106 = vmatpush3.bf16.msra.mxu1 %v1205_v3  ;;  %v1198_v8 = vld [vmem:[%s1301_s19 + $0x8] sm:$0xff]   ;;  %v1199_v9 = vld [vmem:[%s1301_s19 + $0x10] sm:$0xff]   ;;  %s298_s15 = scalar_lea.vmem %s1415_s7, %s995_s12 }
   0xf   : > { %1107 = vmatprep.subr.bf16.mxu1 %v1206_v4  ;;  %1089 = vmatprep.mubr.msk.bf16.mxu0 %vm395_vm0, %v1197_v6  ;;  %v1200_v12 = vld [vmem:[%s1301_s19 + $0x18] sm:$0xff]   ;;  %v1201_v13 = vld [vmem:[%s1301_s19 + $0x20] sm:$0xff]   ;;  %v1202_v14 = vld [vmem:[%s1301_s19 + $0x28] sm:$0xff]  }
  0x10   : > { %v1203_v15 = vld [vmem:[%s1301_s19 + $0x30] sm:$0xff]   ;;  %v1204_v16 = vld [vmem:[%s1301_s19 + $0x38] sm:$0xff]   ;;  %v1211_v18 = vld [vmem:[%s1411_s3 + $0x8] sm:$0xff]  }
  0x11   : > { %1084 = vmatpush3.bf16.msra.mxu0 %v1194_v1  ;;  %v1210_v17 = vld [vmem:[%s1411_s3 + $0x10] sm:$0xff]   ;;  %v1212_v19 = vld [vmem:[%s1411_s3] sm:$0xff]   ;;  %v1213_v20 = vld [vmem:[%s1413_s5 + $0x38] sm:$0xff]  }
  0x12   : > { %1085 = vmatprep.subr.bf16.mxu0 %v1195_v2  ;;  %1108 = vmatpush3.bf16.msra.mxu1 %v1206_v4  ;;  %v1214_v21 = vld [vmem:[%s1413_s5 + $0x30] sm:$0xff]   ;;  %v1215_v22 = vld [vmem:[%s1413_s5 + $0x28] sm:$0xff]   ;;  %v1349_v23 = vld [vmem:[%s1413_s5 + $0x20] sm:$0xff]  }
  0x13   : > { %1109 = vmatprep.subr.bf16.mxu1 %v1207_v7  ;;  %v1355_v24 = vld [vmem:[%s1413_s5 + $0x18] sm:$0xff]   ;;  %v1363_v27 = vld [vmem:[%s1410_s2] ss:$0 sm:$0xff] }
  0x15   : > { %1086 = vmatpush3.bf16.msra.mxu0 %v1195_v2 }
  0x16   : > { %1087 = vmatprep.subr.bf16.mxu0 %v1196_v5  ;;  %1110 = vmatpush3.bf16.msra.mxu1 %v1207_v7 }
  0x17   : > { %1111 = vmatprep.subr.bf16.mxu1 %v1208_v10 }
  0x19   : > { %1088 = vmatpush3.bf16.msra.mxu0 %v1196_v5 }
  0x1a   : > { %1112 = vmatpush3.bf16.msra.mxu1 %v1208_v10  ;;  %1137 = vmatprep.subr.bf16.mxu0 %v1213_v20 }
  0x1b   : > { %1113 = vmatprep.subr.bf16.mxu1 %v1209_v11 }
  0x1c   : > { %1090 = vmatmul.mubr.msk.bf16.vlgmr.msra.gmra.mxu0 %vm395_vm0, %v1198_v8 }
  0x1d   : > { %1093 = vmatprep.mubr.msk.bf16.mxu0 %vm395_vm0, %v1199_v9  ;;  %1138 = vmatpush3.bf16.msra.mxu0 %v1213_v20 }
  0x1e   : > { %1114 = vmatpush3.bf16.msra.mxu1 %v1209_v11  ;;  %1139 = vmatprep.subr.bf16.mxu0 %v1214_v21 }
  0x1f   : > { %1115 = vmatprep.subr.bf16.mxu1 %v1210_v17 }
  0x21   : > { %1140 = vmatpush3.bf16.msra.mxu0 %v1214_v21 }
  0x22   : > { %1116 = vmatpush3.bf16.msra.mxu1 %v1210_v17  ;;  %1141 = vmatprep.subr.bf16.mxu0 %v1215_v22 }
  0x23   : > { %1117 = vmatprep.subr.bf16.mxu1 %v1211_v18 }
  0x24   : > { %1094 = vmatmul.mubr.msk.bf16.gmra.mxu0 %vm395_vm0, %v1200_v12 }
  0x25   : > { %1097 = vmatprep.mubr.msk.bf16.mxu0 %vm395_vm0, %v1201_v13  ;;  %1142 = vmatpush3.bf16.msra.mxu0 %v1215_v22 }
  0x26   : > { %1118 = vmatpush3.bf16.msra.mxu1 %v1211_v18  ;;  %1143 = vmatprep.subr.bf16.mxu0 %v1349_v23  ;;  %v1218_v18 = vld [vmem:[%s1413_s5 + $0x10] sm:$0xff]  }
  0x27   : > { %1119 = vmatprep.subr.bf16.mxu1 %v1212_v19 }
  0x29   : > { %1144 = vmatpush3.bf16.msra.mxu0 %v1349_v23 }
  0x2a   : > { %1120 = vmatpush3.bf16.msra.mxu1 %v1212_v19  ;;  %1145 = vmatprep.subr.bf16.mxu0 %v1355_v24  ;;  %v1219_v19 = vld [vmem:[%s1413_s5 + $0x8] sm:$0xff]  }
  0x2b   : > { %1169 = vmatprep.subr.bf16.mxu1 %v1213_v20 }
  0x2c   : > { %1098 = vmatmul.mubr.msk.bf16.gmra.mxu0 %vm395_vm0, %v1202_v14 }
  0x2d   : > { %1101 = vmatprep.mubr.msk.bf16.mxu0 %vm395_vm0, %v1203_v15  ;;  %1146 = vmatpush3.bf16.msra.mxu0 %v1355_v24 }
  0x2e   : > { %1147 = vmatprep.subr.bf16.mxu0 %v1218_v18 }
  0x31   : > { %1148 = vmatpush3.bf16.msra.mxu0 %v1218_v18 }
  0x32   : > { %1149 = vmatprep.subr.bf16.mxu0 %v1219_v19 }
  0x34   : > { %1102 = vmatmul.mubr.msk.bf16.gmra.mxu0 %vm395_vm0, %v1204_v16 }
  0x35   : > { %1150 = vmatpush3.bf16.msra.mxu0 %v1219_v19 }
  0xdc   : > { %v1091_v25 = vpop.f32.mrf.mxu0 }
  0xdd   : > { %v463_v31 = vadd.f32 %v1091_v25, %v1363_v27 }
  0xde   : > { %v454_v26 = vpop.f32.mrf.mxu0 }
  0xdf   : > { %v455_v29 = vadd.f32 %v1363_v27, %v454_v26  ;;  %v519_v38 = vmax.f32 %v463_v31, 0.0 }
  0xe0   : > { %v1092_v28 = vpop.f32.mrf.mxu0 }
  0xe1   : > { %v466_v30 = vadd.f32 %v1092_v28, %v1363_v27  ;;  %v517_v36 = vmax.f32 %v455_v29, 0.0 }
  0xe2   : > { %v457_v32 = vpop.f32.mrf.mxu0 }
  0xe3   : > { %v458_v33 = vadd.f32 %v1363_v27, %v457_v32  ;;  %v520_v34 = vmax.f32 %v466_v30, 0.0 }
  0xe4   : > { %v1095_v35 = vpop.f32.mrf.mxu0 }
  0xe5   : > { %v518_v37 = vmax.f32 %v458_v33, 0.0  ;;  %v479_v39 = vadd.f32 %v1095_v35, %v1363_v27  ;;  %v534_v43 = vpack.c.bf16 %v520_v34, %v519_v38 }
  0xe6   : > { %v470_v40 = vpop.f32.mrf.mxu0 }
  0xe7   : > { %v471_v41 = vadd.f32 %v1363_v27, %v470_v40  ;;  %v533_v42 = vpack.c.bf16 %v518_v37, %v517_v36  ;;  %v523_v46 = vmax.f32 %v479_v39, 0.0 }
  0xe8   : > { %v1096_v44 = vpop.f32.mrf.mxu0 }
  0xe9   : > { %v482_v45 = vadd.f32 %v1096_v44, %v1363_v27  ;;  %1121 = vmatprep.mubr.bf16.mxu1 %v533_v42  ;;  %v521_v48 = vmax.f32 %v471_v41, 0.0 }
  0xea   : > { %v473_v47 = vpop.f32.mrf.mxu0  ;;  %1122 = vmatmul.mubr.bf16.vlgmr.msra.gmra.mxu1 %v534_v43 }
  0xeb   : > { %v524_v49 = vmax.f32 %v482_v45, 0.0  ;;  %v474_v50 = vadd.f32 %v1363_v27, %v473_v47  ;;  %1177 = vmatpush3.bf16.msra.mxu1 %v1213_v20  ;;  %v1220_v20 = vld [vmem:[%s1413_s5] sm:$0xff]  }
  0xec   : > { %v1099_v51 = vpop.f32.mrf.mxu0  ;;  %1170 = vmatprep.subr.bf16.mxu1 %v1214_v21  ;;  %1151 = vmatprep.subr.bf16.mxu0 %v1220_v20 }
  0xed   : > { %v522_v52 = vmax.f32 %v474_v50, 0.0  ;;  %v536_v53 = vpack.c.bf16 %v524_v49, %v523_v46  ;;  %v495_v54 = vadd.f32 %v1099_v51, %v1363_v27  ;;  %1152 = vmatpush3.bf16.msra.mxu0 %v1220_v20 }
  0xee   : > { %v486_v55 = vpop.f32.mrf.mxu0 }
  0xef   : > { %v535_v56 = vpack.c.bf16 %v522_v52, %v521_v48  ;;  %v487_v57 = vadd.f32 %v1363_v27, %v486_v55  ;;  %1178 = vmatpush3.bf16.msra.mxu1 %v1214_v21  ;;  %v527_v60 = vmax.f32 %v495_v54, 0.0 }
  0xf0   : > { %v1100_v58 = vpop.f32.mrf.mxu0  ;;  %1171 = vmatprep.subr.bf16.mxu1 %v1215_v22 }
  0xf1   : > { %v498_v59 = vadd.f32 %v1100_v58, %v1363_v27  ;;  %1125 = vmatprep.mubr.bf16.mxu1 %v535_v56  ;;  %v525_v62 = vmax.f32 %v487_v57, 0.0 }
  0xf2   : > { %v489_v61 = vpop.f32.mrf.mxu0  ;;  %1126 = vmatmul.mubr.bf16.gmra.mxu1 %v536_v53 }
  0xf3   : > { %v528_v63 = vmax.f32 %v498_v59, 0.0  ;;  %v490_v0 = vadd.f32 %v1363_v27, %v489_v61  ;;  %1179 = vmatpush3.bf16.msra.mxu1 %v1215_v22 }
  0xf4   : > { %v1103_v1 = vpop.f32.mrf.mxu0  ;;  %1172 = vmatprep.subr.bf16.mxu1 %v1349_v23 }
  0xf5   : > { %v526_v2 = vmax.f32 %v490_v0, 0.0  ;;  %v538_v3 = vpack.c.bf16 %v528_v63, %v527_v60  ;;  %v511_v4 = vadd.f32 %v1103_v1, %v1363_v27 }
  0xf6   : > { %v502_v5 = vpop.f32.mrf.mxu0 }
  0xf7   : > { %v537_v6 = vpack.c.bf16 %v526_v2, %v525_v62  ;;  %v503_v7 = vadd.f32 %v1363_v27, %v502_v5  ;;  %1180 = vmatpush3.bf16.msra.mxu1 %v1349_v23  ;;  %v531_v10 = vmax.f32 %v511_v4, 0.0  ;;  %v1017_v23 = vld [vmem:[%s1412_s4] ss:$0 sm:$0xff] }
  0xf8   : > { %v1104_v8 = vpop.f32.mrf.mxu0  ;;  %1173 = vmatprep.subr.bf16.mxu1 %v1355_v24 }
  0xf9   : > { %1129 = vmatprep.mubr.bf16.mxu1 %v537_v6  ;;  %v514_v9 = vadd.f32 %v1104_v8, %v1363_v27  ;;  %v529_v12 = vmax.f32 %v503_v7, 0.0 }
  0xfa   : > { %1130 = vmatmul.mubr.bf16.gmra.mxu1 %v538_v3  ;;  %v505_v11 = vpop.f32.mrf.mxu0 }
  0xfb   : > { %v532_v13 = vmax.f32 %v514_v9, 0.0  ;;  %v506_v14 = vadd.f32 %v1363_v27, %v505_v11  ;;  %1181 = vmatpush3.bf16.msra.mxu1 %v1355_v24 }
  0xfc   : > { %1174 = vmatprep.subr.bf16.mxu1 %v1218_v18 }
  0xfd   : > { %v530_v15 = vmax.f32 %v506_v14, 0.0  ;;  %v540_v16 = vpack.c.bf16 %v532_v13, %v531_v10 }
  0xff   : > { %v539_v17 = vpack.c.bf16 %v530_v15, %v529_v12  ;;  %1182 = vmatpush3.bf16.msra.mxu1 %v1218_v18  ;;  %v1026_v15 = vld [vmem:[%s1414_s6] ss:$0 sm:$0xff] }
 0x100   : > { %1175 = vmatprep.subr.bf16.mxu1 %v1219_v19 }
 0x101   : > { %1133 = vmatprep.mubr.bf16.mxu1 %v539_v17 }
 0x102   : > { %1134 = vmatmul.mubr.bf16.gmra.mxu1 %v540_v16 }
 0x103   : > { %1183 = vmatpush3.bf16.msra.mxu1 %v1219_v19 }
 0x104   : > { %1176 = vmatprep.subr.bf16.mxu1 %v1220_v20 }
 0x107   : > { %1184 = vmatpush3.bf16.msra.mxu1 %v1220_v20 }
 0x1aa   : > { %v1123_v21 = vpop.f32.mrf.mxu1 }
 0x1ab   : > { %v655_v27 = vadd.f32 %v1123_v21, %v1017_v23 }
 0x1ac   : > { %v646_v22 = vpop.f32.mrf.mxu1 }
 0x1ad   : > { %v647_v25 = vadd.f32 %v1017_v23, %v646_v22  ;;  %v711_v34 = vmax.f32 %v655_v27, 0.0 }
 0x1ae   : > { %v1124_v24 = vpop.f32.mrf.mxu1 }
 0x1af   : > { %v658_v26 = vadd.f32 %v1124_v24, %v1017_v23  ;;  %v709_v32 = vmax.f32 %v647_v25, 0.0 }
 0x1b0   : > { %v649_v28 = vpop.f32.mrf.mxu1 }
 0x1b1   : > { %v650_v29 = vadd.f32 %v1017_v23, %v649_v28  ;;  %v712_v30 = vmax.f32 %v658_v26, 0.0 }
 0x1b2   : > { %v1127_v31 = vpop.f32.mrf.mxu1 }
 0x1b3   : > { %v710_v33 = vmax.f32 %v650_v29, 0.0  ;;  %v726_v37 = vpack.c.bf16 %v712_v30, %v711_v34  ;;  %v671_v41 = vadd.f32 %v1127_v31, %v1017_v23 }
 0x1b4   : > { %v662_v35 = vpop.f32.mrf.mxu1 }
 0x1b5   : > { %v725_v36 = vpack.c.bf16 %v710_v33, %v709_v32  ;;  %v663_v39 = vadd.f32 %v1017_v23, %v662_v35  ;;  %v715_v48 = vmax.f32 %v671_v41, 0.0 }
 0x1b6   : > { %v1128_v38 = vpop.f32.mrf.mxu1 }
 0x1b7   : > { %v674_v40 = vadd.f32 %v1128_v38, %v1017_v23  ;;  %1153 = vmatprep.mubr.bf16.mxu0 %v725_v36  ;;  %v713_v46 = vmax.f32 %v663_v39, 0.0 }
 0x1b8   : > { %v665_v42 = vpop.f32.mrf.mxu1  ;;  %1154 = vmatmul.mubr.bf16.vlgmr.msra.gmra.mxu0 %v726_v37 }
 0x1b9   : > { %v666_v43 = vadd.f32 %v1017_v23, %v665_v42  ;;  %v716_v44 = vmax.f32 %v674_v40, 0.0 }
 0x1ba   : > { %v1131_v45 = vpop.f32.mrf.mxu1 }
 0x1bb   : > { %v714_v47 = vmax.f32 %v666_v43, 0.0  ;;  %v687_v49 = vadd.f32 %v1131_v45, %v1017_v23  ;;  %v728_v53 = vpack.c.bf16 %v716_v44, %v715_v48 }
 0x1bc   : > { %v678_v50 = vpop.f32.mrf.mxu1 }
 0x1bd   : > { %v727_v51 = vpack.c.bf16 %v714_v47, %v713_v46  ;;  %v679_v52 = vadd.f32 %v1017_v23, %v678_v50  ;;  %v719_v56 = vmax.f32 %v687_v49, 0.0 }
 0x1be   : > { %v1132_v54 = vpop.f32.mrf.mxu1 }
 0x1bf   : > { %v690_v55 = vadd.f32 %v1132_v54, %v1017_v23  ;;  %1157 = vmatprep.mubr.bf16.mxu0 %v727_v51  ;;  %v717_v58 = vmax.f32 %v679_v52, 0.0 }
 0x1c0   : > { %v681_v57 = vpop.f32.mrf.mxu1  ;;  %1158 = vmatmul.mubr.bf16.gmra.mxu0 %v728_v53 }
 0x1c1   : > { %v720_v59 = vmax.f32 %v690_v55, 0.0  ;;  %v682_v60 = vadd.f32 %v1017_v23, %v681_v57 }
 0x1c2   : > { %v1135_v61 = vpop.f32.mrf.mxu1 }
 0x1c3   : > { %v718_v62 = vmax.f32 %v682_v60, 0.0  ;;  %v730_v63 = vpack.c.bf16 %v720_v59, %v719_v56  ;;  %v703_v0 = vadd.f32 %v1135_v61, %v1017_v23 }
 0x1c4   : > { %v694_v1 = vpop.f32.mrf.mxu1 }
 0x1c5   : > { %v729_v2 = vpack.c.bf16 %v718_v62, %v717_v58  ;;  %v695_v3 = vadd.f32 %v1017_v23, %v694_v1  ;;  %v723_v6 = vmax.f32 %v703_v0, 0.0 }
 0x1c6   : > { %v1136_v4 = vpop.f32.mrf.mxu1 }
 0x1c7   : > { %1161 = vmatprep.mubr.bf16.mxu0 %v729_v2  ;;  %v706_v5 = vadd.f32 %v1136_v4, %v1017_v23  ;;  %v721_v8 = vmax.f32 %v695_v3, 0.0 }
 0x1c8   : > { %1162 = vmatmul.mubr.bf16.gmra.mxu0 %v730_v63  ;;  %v697_v7 = vpop.f32.mrf.mxu1 }
 0x1c9   : > { %v724_v9 = vmax.f32 %v706_v5, 0.0  ;;  %v698_v10 = vadd.f32 %v1017_v23, %v697_v7 }
 0x1cb   : > { %v722_v11 = vmax.f32 %v698_v10, 0.0  ;;  %v732_v12 = vpack.c.bf16 %v724_v9, %v723_v6 }
 0x1cd   : > { %v731_v13 = vpack.c.bf16 %v722_v11, %v721_v8 }
 0x1cf   : > { %1165 = vmatprep.mubr.bf16.mxu1 %v731_v13 }
 0x1d0   : > { %1166 = vmatmul.mubr.bf16.vlgmr.msra.gmra.mxu1 %v732_v12 }
 0x278   : > { %v1155_v14 = vpop.f32.mrf.mxu0 }
 0x279   : > { %v847_v22 = vadd.f32 %v1155_v14, %v1026_v15 }
 0x27a   : > { %v838_v16 = vpop.f32.mrf.mxu0 }
 0x27b   : > { %v839_v17 = vadd.f32 %v1026_v15, %v838_v16 }
 0x27c   : > { %v1156_v18 = vpop.f32.mrf.mxu0 }
 0x27d   : > { %901 = vxpose.xlu0.b32.start [1/16] (narrow) %v839_v17, 8  ;;  %v850_v24 = vadd.f32 %v1156_v18, %v1026_v15 }
 0x27e   : > { %v841_v19 = vpop.f32.mrf.mxu0 }
 0x27f   : > { %v842_v20 = vadd.f32 %v1026_v15, %v841_v19 }
 0x280   : > { %v1159_v21 = vpop.f32.mrf.mxu0 }
 0x281   : > { %902 = vxpose.xlu0.b32.cont [2/16] (narrow) %v842_v20, 8  ;;  %v863_v30 = vadd.f32 %v1159_v21, %v1026_v15 }
 0x282   : > { %v854_v23 = vpop.f32.mrf.mxu0 }
 0x283   : > { %v855_v26 = vadd.f32 %v1026_v15, %v854_v23 }
 0x284   : > { %v1160_v25 = vpop.f32.mrf.mxu0 }
 0x285   : > { %903 = vxpose.xlu0.b32.cont [3/16] (narrow) %v847_v22, 8  ;;  %v866_v32 = vadd.f32 %v1160_v25, %v1026_v15 }
 0x286   : > { %v857_v27 = vpop.f32.mrf.mxu0 }
 0x287   : > { %v858_v28 = vadd.f32 %v1026_v15, %v857_v27 }
 0x288   : > { %v1163_v29 = vpop.f32.mrf.mxu0 }
 0x289   : > { %904 = vxpose.xlu0.b32.cont [4/16] (narrow) %v850_v24, 8  ;;  %v879_v38 = vadd.f32 %v1163_v29, %v1026_v15 }
 0x28a   : > { %v870_v31 = vpop.f32.mrf.mxu0 }
 0x28b   : > { %v871_v34 = vadd.f32 %v1026_v15, %v870_v31 }
 0x28c   : > { %v1164_v33 = vpop.f32.mrf.mxu0 }
 0x28d   : > { %905 = vxpose.xlu0.b32.cont [5/16] (narrow) %v855_v26, 8  ;;  %v882_v40 = vadd.f32 %v1164_v33, %v1026_v15 }
 0x28e   : > { %v873_v35 = vpop.f32.mrf.mxu0 }
 0x28f   : > { %v874_v36 = vadd.f32 %v1026_v15, %v873_v35 }
 0x290   : > { %v1167_v37 = vpop.f32.mrf.mxu1 }
 0x291   : > { %906 = vxpose.xlu0.b32.cont [6/16] (narrow) %v858_v28, 8  ;;  %v895_v45 = vadd.f32 %v1167_v37, %v1026_v15 }
 0x292   : > { %v886_v39 = vpop.f32.mrf.mxu1 }
 0x293   : > { %v887_v42 = vadd.f32 %v1026_v15, %v886_v39 }
 0x294   : > { %v1168_v41 = vpop.f32.mrf.mxu1 }
 0x295   : > { %907 = vxpose.xlu0.b32.cont [7/16] (narrow) %v863_v30, 8  ;;  %v898_v46 = vadd.f32 %v1168_v41, %v1026_v15 }
 0x296   : > { %v889_v43 = vpop.f32.mrf.mxu1 }
 0x297   : > { %v890_v44 = vadd.f32 %v1026_v15, %v889_v43 }
 0x299   : > { %908 = vxpose.xlu0.b32.cont [8/16] (narrow) %v866_v32, 8 }
 0x29d   : > { %909 = vxpose.xlu0.b32.cont [9/16] (narrow) %v871_v34, 8 }
 0x2a1   : > { %910 = vxpose.xlu0.b32.cont [10/16] (narrow) %v874_v36, 8 }
 0x2a5   : > { %911 = vxpose.xlu0.b32.cont [11/16] (narrow) %v879_v38, 8 }
 0x2a9   : > { %912 = vxpose.xlu0.b32.cont [12/16] (narrow) %v882_v40, 8 }
 0x2ad   : > { %913 = vxpose.xlu0.b32.cont [13/16] (narrow) %v887_v42, 8 }
 0x2b1   : > { %914 = vxpose.xlu0.b32.cont [14/16] (narrow) %v890_v44, 8 }
 0x2b5   : > { %915 = vxpose.xlu0.b32.cont [15/16] (narrow) %v895_v45, 8 }
 0x2b9   : > { %916 = vxpose.xlu0.b32.end [16/16] (narrow) %v898_v46, 8 }
 0x2f9   : > { %v917_v47 = vpop.trf.xlu0 }
 0x2fa   : > { %v933_v48 = vpack.c.bf16 %v917_v47, %v917_v47 }
 0x2fc   : > { %934 = vst [vmem:[%s298_s15] sm:$0xf] %v933_v48 }
 0x2fd PF: > { %s17_s24 = sadd.s32 1, %s1227_s24  }
 0x2fe   : > { %p14_p5 = scmp.ge.s32.totalorder %s17_s24, 4  }
 0x300   :  { %16 = sbr.rel (!%p14_p5) target bundleno = 1 (0x1), region = 78 }

</bundles_post_ra>
